<compile_context>
chip_gen: v7x
topology: tpu7x:2x2x1
jax: 0.10.0
libtpu: 0.0.40
codegen_flags: <defaults>
</compile_context>

<pallas_src>
import jax
import jax.numpy as jnp
from jax.experimental import pallas as pl
from jax.experimental.pallas import tpu as pltpu


def _rotary_kernel(cos_ref, sin_ref, x_ref, o_ref):
    """One (1, block_rows, D) slab: out = x*cos_full + roll(x, D/2)*sin_signed."""
    x = x_ref[0].astype(cos_ref.dtype)                       # (block_rows, D)
    # Per-row swap of the two halves: [x1, x2] -> [x2, x1] (XLU lane rotate).
    x_swap = pltpu.roll(x, shift=x.shape[-1] // 2, axis=1)   # positive axis only
    o_ref[0] = (x * cos_ref[...] + x_swap * sin_ref[...]).astype(o_ref.dtype)


# ---- cached cos/sin tables (mirrors the PyTorch module's cached buffers) ----
_TABLE_CACHE = {}


def _rope_tables(T, H, D, base, dtype):
    key = (int(T), int(H), int(D), float(base), jnp.dtype(dtype).name)
    hit = _TABLE_CACHE.get(key)
    if hit is not None:
        return hit
    inv_freq = (1.0 / base) ** (jnp.arange(0, D, 2, dtype=jnp.float32) / D)   # [D/2]
    freqs = jnp.outer(jnp.arange(T, dtype=jnp.float32), inv_freq)             # [T, D/2]
    cos_h, sin_h = jnp.cos(freqs), jnp.sin(freqs)
    cos_full = jnp.concatenate([cos_h, cos_h], axis=-1)                       # [T, D]
    sin_signed = jnp.concatenate([sin_h, -sin_h], axis=-1)                    # [T, D]
    # Repeat per head so rows line up with the (T*H)-row-collapsed x.
    cos_rep = jnp.repeat(cos_full, H, axis=0).astype(dtype)                   # [T*H, D]
    sin_rep = jnp.repeat(sin_signed, H, axis=0).astype(dtype)                 # [T*H, D]
    if not isinstance(cos_rep, jax.core.Tracer):   # don't cache under tracing
        _TABLE_CACHE[key] = (cos_rep, sin_rep)
    return cos_rep, sin_rep


def rotary_forward(x, base=10000.0, *, block_rows=None, compute_dtype=None,
                   vmem_budget_bytes=24 << 20, donate_x=False):
    """Pallas implementation of Rotary.forward for x of shape [B, T, H, D]."""
    B, T, H, D = x.shape
    assert D % 2 == 0, "head dim must be even"
    R = T * H

    if compute_dtype is None:
        compute_dtype = jnp.float32          # matches the reference; v5e-safe
    cos_rep, sin_rep = _rope_tables(T, H, D, base, compute_dtype)

    xr = x.reshape(B, R, D)                  # free (T, H adjacent, row-major)

    # Size the row tile from the full double-buffered footprint:
    # 2 buffers x (x-in + out + cos + sin) per row.
    if block_rows is None:
        bytes_per_row = 2 * D * (2 * x.dtype.itemsize
                                 + 2 * jnp.dtype(compute_dtype).itemsize)
        block_rows = max(8, vmem_budget_bytes // bytes_per_row)
    block_rows = int(block_rows)
    if block_rows >= R:
        block_rows = R                       # full axis: no alignment needed
    else:
        block_rows = max(8, (block_rows // 8) * 8)   # sublane-aligned tile

    grid = (pl.cdiv(R, block_rows), B)       # row tiles outer, batch inner

    extra = {}
    if donate_x:
        # RoPE is pure elementwise; reuse x's HBM buffer for the output.
        extra["input_output_aliases"] = {2: 0}

    out = pl.pallas_call(
        _rotary_kernel,
        out_shape=jax.ShapeDtypeStruct((B, R, D), x.dtype),
        grid=grid,
        in_specs=[
            pl.BlockSpec((block_rows, D), lambda r, b: (r, 0)),        # cos_full
            pl.BlockSpec((block_rows, D), lambda r, b: (r, 0)),        # sin_signed
            pl.BlockSpec((1, block_rows, D), lambda r, b: (b, r, 0)),  # x
        ],
        out_specs=pl.BlockSpec((1, block_rows, D), lambda r, b: (b, r, 0)),
        compiler_params=pltpu.CompilerParams(
            dimension_semantics=("parallel", "parallel"),
            vmem_limit_bytes=48 << 20,
        ),
        **extra,
    )(cos_rep, sin_rep, xr)
    return out.reshape(B, T, H, D)


def _rotary_ref(x, base=10000.0):
    """Pure-JAX reference matching the PyTorch forward."""
    B, T, H, D = x.shape
    inv_freq = (1.0 / base) ** (jnp.arange(0, D, 2, dtype=jnp.float32) / D)
    freqs = jnp.outer(jnp.arange(T, dtype=jnp.float32), inv_freq)
    cos = jnp.cos(freqs)[None, :, None, :]
    sin = jnp.sin(freqs)[None, :, None, :]
    x1, x2 = x[..., : D // 2], x[..., D // 2:]
    y1 = x1 * cos + x2 * sin
    y2 = -x1 * sin + x2 * cos
    return jnp.concatenate([y1, y2], axis=-1).astype(x.dtype)


if __name__ == "__main__":
    key = jax.random.PRNGKey(0)
    B, T, H, D = 2, 16, 4, 128          # small, but with a realistic head_dim
    x = jax.random.normal(key, (B, T, H, D), dtype=jnp.float32)

    # Default tiling (block_rows == T*H here) and an explicit 4-tile row split.
    out = jax.block_until_ready(rotary_forward(x))
    out_tiled = jax.block_until_ready(rotary_forward(x, block_rows=16))

    ref = _rotary_ref(x)
    assert out.shape == x.shape and out.dtype == x.dtype
    assert jnp.allclose(out, ref, atol=1e-5, rtol=1e-5)
    assert jnp.allclose(out_tiled, ref, atol=1e-5, rtol=1e-5)
    print("KERNEL_OK")
</pallas_src>

<mosaic_0001>
module attributes {stable_mosaic.version = 11 : i64} {
  func.func @_rotary_kernel(%arg0: i32, %arg1: i32, %arg2: memref<64x128xf32, #tpu.memory_space<vmem>>, %arg3: memref<64x128xf32, #tpu.memory_space<vmem>>, %arg4: memref<1x64x128xf32, #tpu.memory_space<vmem>>, %arg5: memref<1x64x128xf32, #tpu.memory_space<vmem>>) attributes {dimension_semantics = [#tpu.dimension_semantics<parallel>, #tpu.dimension_semantics<parallel>], iteration_bounds = array<i64: 1, 2>, scalar_prefetch = 0 : i64, scratch_operands = 0 : i64, tpu.core_type = #tpu.core_type<tc>, window_params = [{transform_indices = @transform_0, window_bounds = array<i64: 64, 128>}, {transform_indices = @transform_1, window_bounds = array<i64: 64, 128>}, {transform_indices = @transform_2, window_bounds = array<i64: 1, 64, 128>}, {transform_indices = @transform_3, window_bounds = array<i64: 1, 64, 128>}]} {
    %c0 = arith.constant 0 : index
    %c0_0 = arith.constant 0 : index
    %c0_1 = arith.constant 0 : index
    %0 = vector.load %arg4[%c0, %c0_0, %c0_1] : memref<1x64x128xf32, #tpu.memory_space<vmem>>, vector<1x64x128xf32>
    %1 = vector.shape_cast %0 : vector<1x64x128xf32> to vector<64x128xf32>
    %c64_i32 = arith.constant 64 : i32
    %2 = tpu.dynamic_rotate %1 by %c64_i32 dim 1 : vector<64x128xf32>, i32 -> vector<64x128xf32>
    %c0_2 = arith.constant 0 : index
    %c0_3 = arith.constant 0 : index
    %3 = vector.load %arg2[%c0_2, %c0_3] : memref<64x128xf32, #tpu.memory_space<vmem>>, vector<64x128xf32>
    %4 = arith.mulf %1, %3 : vector<64x128xf32>
    %c0_4 = arith.constant 0 : index
    %c0_5 = arith.constant 0 : index
    %5 = vector.load %arg3[%c0_4, %c0_5] : memref<64x128xf32, #tpu.memory_space<vmem>>, vector<64x128xf32>
    %6 = arith.mulf %2, %5 : vector<64x128xf32>
    %7 = arith.addf %4, %6 : vector<64x128xf32>
    %c0_6 = arith.constant 0 : index
    %c0_7 = arith.constant 0 : index
    %c0_8 = arith.constant 0 : index
    %8 = vector.load %arg5[%c0_6, %c0_7, %c0_8] : memref<1x64x128xf32, #tpu.memory_space<vmem>>, vector<1x64x128xf32>
    %9 = vector.shape_cast %8 : vector<1x64x128xf32> to vector<64x128xf32>
    %10 = vector.shape_cast %7 : vector<64x128xf32> to vector<1x64x128xf32>
    tpu.vector_store %arg5[%c0_6, %c0_7, %c0_8], %10 {strides = array<i32>} : memref<1x64x128xf32, #tpu.memory_space<vmem>>, vector<1x64x128xf32>,
    return
  }
  func.func @transform_0(%arg0: i32, %arg1: i32) -> (i32, i32) {
    %c0_i32 = arith.constant 0 : i32
    %c0_i32_0 = arith.constant 0 : i32
    return %arg0, %c0_i32 : i32, i32
  }
  func.func @transform_1(%arg0: i32, %arg1: i32) -> (i32, i32) {
    %c0_i32 = arith.constant 0 : i32
    %c0_i32_0 = arith.constant 0 : i32
    return %arg0, %c0_i32 : i32, i32
  }
  func.func @transform_2(%arg0: i32, %arg1: i32) -> (i32, i32, i32) {
    %c0_i32 = arith.constant 0 : i32
    %c0_i32_0 = arith.constant 0 : i32
    return %arg1, %arg0, %c0_i32 : i32, i32, i32
  }
  func.func @transform_3(%arg0: i32, %arg1: i32) -> (i32, i32, i32) {
    %c0_i32 = arith.constant 0 : i32
    %c0_i32_0 = arith.constant 0 : i32
    return %arg1, %arg0, %c0_i32 : i32, i32, i32
  }
}

</mosaic_0001>

<bundles_post_ra>
// kernel: tpu_custom_call.1
= control target key start
LH: loop header
LB: loop body
LE: loop exit
PB: predicated region body
PF: predicated region fallthrough
CT: control target
= control target key end

     0   :  { %8 = vsyncpa [#allocation3], 0  ;;  %s1051_s0 = inlined_call_operand.hbm [shape: f32[64,128], index: 0, kind: input, shape index: {}]   ;;  %s1052_s1 = inlined_call_operand.hbm [shape: f32[64,128], index: 1, kind: input, shape index: {}]   ;;  %s1053_s2 = inlined_call_operand.hbm [shape: f32[2,64,128], index: 2, kind: input, shape index: {}]   ;;  %s1054_s3 = inlined_call_operand.hbm [shape: f32[2,64,128], index: 3, kind: output, shape index: {}]  }
   0x1   :  { %9 = vsyncpa [#allocation6], 0 }
   0x2   :  { %10 = vsyncpa [#allocation4], 0 }
   0x3   :  { %12 = vsyncpa [#allocation4 + $0x1], 0  ;;  %s768_s12 = smov 0   ;;  %s770_s13 = smov 0  }
   0x4   :  { %s772_s14 = smov 0   ;;  %s774_s15 = smov 0  }
   0x5   :  { %s776_s16 = smov 0   ;;  %s778_s17 = smov 0  }
   0x6 LB: > { %s799_s18 = sadd.s32 4294967295, %s737_s17   ;;  %s453_s19 = sadd.s32 4294967294, %s737_s17   ;;  %s737_s17 = sphi %s778_s17, %s18_s17   ;;  %s733_s16 = sphi %s776_s16, %s1079_s16   ;;  %s729_s15 = sphi %s774_s15, %s1078_s15   ;;  %s725_s14 = sphi %s772_s14, %s1077_s14   ;;  %s721_s13 = sphi %s770_s13, %s1076_s13   ;;  %s717_s12 = sphi %s768_s12, %s1075_s12  }
   0x7   : > { %p98_p0 = scmp.ne.s32.totalorder %s725_s14, %s721_s13  ;;  %p99_p1 = scmp.eq.s32.totalorder %s737_s17, 0 }
   0x8   : > { %p104_p2 = scmp.ne.s32.totalorder %s721_s13, %s717_s12  ;;  %p1055_p3 = scmp.eq.s32.totalorder %s799_s18, 0 }
   0x9   : > { %p808_p4 = por %p99_p1, %p98_p0  ;;  %p130_p5 = scmp.eq.s32.totalorder %s799_s18, 1 }
   0xa   : > { %p815_p6 = por %p1055_p3, %p104_p2  ;;  %p136_p7 = scmp.eq.s32.totalorder %s453_s19, 1 }
   0xb   : > { %p819_p8 = por %p130_p5, %p98_p0  ;;  %p454_p9 = scmp.ge.s32.totalorder %s737_s17, 1 }
   0xc   : > { %s1060_s21 = scalar_select %p815_p6, 1, 0 }
   0xd   : > { %s1061_s22 = scalar_select %p819_p8, 1, 0 }
   0xe   : > { %p824_p10 = por %p136_p7, %p104_p2  ;;  %p143_p11 = scmp.lt.s32.totalorder %s737_s17, 3 }
   0xf   : > { %s739_s25 = smov [#allocation2]   ;;  %p502_p1 = scmp.lt.s32.totalorder %s737_s17, 2 }
  0x10   : > { %s1062_s23 = scalar_select %p824_p10, 1, 0 }
  0x11   : > { %p829_p12 = pnand %p454_p9, %p143_p11  ;;  %s158_s26 = sshll.u32 %s739_s25, 4  ;;  %s833_s26 = int_to_ptr.vmem [resolvable:$true] %s158_s26 }
  0x12   : > { %p847_p2 = pnand %p502_p1, %p808_p4  ;;  %s740_s29 = smov [#allocation5]  }
  0x13   : > { %p485_p13 = pneg %p829_p12  ;;  %s174_s30 = sshll.u32 %s740_s29, 4  ;;  %s851_s30 = int_to_ptr.vmem [resolvable:$true] %s174_s30 }
  0x14   : > { %s561_s6 = scalar_lea.hbm %s1051_s0, 1024 }
  0x15   : > { %p841_p5 = pnand %p485_p13, %p1055_p3  ;;  %p562_p7 = scmp.ne.s32.totalorder %s1051_s0, %s561_s6 }
  0x16   : > { %p568_p13 = scmp.lt.u32.totalorder %s561_s6, %s1051_s0 }
  0x17   : > { %p563_p9 = pneg %p841_p5 }
  0x19   : > { %p564_p4 = pnand %p563_p9, %p562_p7 }
  0x1b   : > { %p565_p11 = pneg %p564_p4 }
  0x1d   : > { %p570_p1 = pnand %p568_p13, %p565_p11 }
  0x1f   : > { %573 = shalt.err (!%p570_p1)
}
  0x20   : > { %s574_s11 = scalar_lea.vmem %s833_s26, 1024  ;;  %p582_p8 = scmp.lt.s32.totalorder %s833_s26, %s833_s26 }
  0x21   : > { %p575_p0 = scmp.ne.s32.totalorder %s833_s26, %s574_s11  ;;  %p583_p7 = scmp.lt.s32.totalorder %s574_s11, %s574_s11 }
  0x23   : > { %p577_p3 = pnand %p575_p0, %p563_p9  ;;  %p584_p4 = por %p583_p7, %p582_p8 }
  0x25   : > { %p578_p10 = pneg %p577_p3 }
  0x27   : > { %p585_p6 = pnand %p584_p4, %p578_p10 }
  0x29   : > { %588 = shalt.err (!%p585_p6)
}
  0x2a   : > { %s1058_s19 = smov 128   ;;  %s742_s20 = smov 8  }
  0x2b   : > { %488 = dma.hbm_to_vmem [thread:$0]  (!%p841_p5), %s1051_s0, 1024, %s833_s26, [#allocation3], %s1058_s19, %s1058_s19, %s742_s20  }
  0x2c   : > { %s589_s6 = scalar_lea.hbm %s1052_s1, 1024 }
  0x2d   : > { %p590_p3 = scmp.ne.s32.totalorder %s1052_s1, %s589_s6  ;;  %p596_p10 = scmp.lt.u32.totalorder %s589_s6, %s1052_s1 }
  0x2f   : > { %p592_p6 = pnand %p590_p3, %p563_p9 }
  0x31   : > { %p593_p8 = pneg %p592_p6 }
  0x33   : > { %p598_p0 = pnand %p596_p10, %p593_p8 }
  0x35   : > { %601 = shalt.err (!%p598_p0)
}
  0x36   : > { %s602_s26 = scalar_lea.vmem %s851_s30, 1024  ;;  %p610_p7 = scmp.lt.s32.totalorder %s851_s30, %s851_s30 }
  0x37   : > { %p603_p11 = scmp.ne.s32.totalorder %s851_s30, %s602_s26  ;;  %p611_p4 = scmp.lt.s32.totalorder %s602_s26, %s602_s26 }
  0x39   : > { %p605_p13 = pnand %p603_p11, %p563_p9  ;;  %p612_p3 = por %p611_p4, %p610_p7 }
  0x3b   : > { %p606_p1 = pneg %p605_p13 }
  0x3d   : > { %p613_p6 = pnand %p612_p3, %p606_p1 }
  0x3f   : > { %616 = shalt.err (!%p613_p6)
}
  0x40   : > { %491 = dma.hbm_to_vmem [thread:$0]  (!%p841_p5), %s1052_s1, 1024, %s851_s30, [#allocation6], %s1058_s19, %s1058_s19, %s742_s20  }
  0x41   : > { %s91_s29 = sadd.s32 1, %s725_s14  ;;  %s27_s4 = sadd.s32 1, %s733_s16 }
  0x42   : > { %s188_s5 = sand.u32 1, %s737_s17   ;;  %p28_p9 = scmp.ge.s32.totalorder %s27_s4, 2 }
  0x43   : > { %s190_s27 = sand.u32 1, %s725_s14   ;;  %s471_s6 = sshll.u32 %s733_s16, 10 }
  0x44   : > { %s1081_s4 = smov (%p28_p9, %s27_s4), 0  ;;  %s458_s7 = sshll.u32 %s190_s27, 6 }
  0x45   : > { %s921_s10 = scalar_lea.hbm %s1053_s2, %s471_s6  ;;  %s86_s30 = ssub.s32 %s733_s16, %s1081_s4 }
  0x46   : > { %p89_p5 = scmp.eq.s32.totalorder %s86_s30, 0  ;;  %s192_s26 = scalar_lea.vmem [#allocation7], %s458_s7 }
  0x47   : > { %s201_s11 = sshll.u32 %s192_s26, 4  ;;  %s930_s19 = scalar_lea.sflag [#allocation3], %s188_s5  ;;  %s925_s11 = int_to_ptr.vmem [resolvable:$true] %s201_s11 }
  0x48   : > { %s928_s25 = scalar_select %p89_p5, %s725_s14, %s91_s29  }
  0x49   : > { %s617_s27 = scalar_lea.hbm %s921_s10, 1024  ;;  %p619_p10 = pneg %p847_p2 }
  0x4a   : > { %p618_p8 = scmp.ne.s32.totalorder %s921_s10, %s617_s27  ;;  %s622_s9 = scalar_lea.hbm %s1053_s2, 2048 }
  0x4b   : > { %p623_p13 = scmp.lt.u32.totalorder %s921_s10, %s1053_s2  ;;  %p624_p1 = scmp.lt.u32.totalorder %s622_s9, %s617_s27 }
  0x4c   : > { %p620_p0 = pnand %p619_p10, %p618_p8  ;;  %p626_p4 = scmp.lt.u32.totalorder %s617_s27, %s921_s10 }
  0x4d   : > { %p625_p7 = por %p624_p1, %p623_p13 }
  0x4e   : > { %p621_p11 = pneg %p620_p0 }
  0x4f   : > { %p627_p3 = por %p626_p4, %p625_p7 }
  0x51   : > { %p628_p6 = pnand %p627_p3, %p621_p11 }
  0x53   : > { %631 = shalt.err (!%p628_p6)
}
  0x54   : > { %s632_s29 = scalar_lea.vmem %s925_s11, 1024  ;;  %s743_s5 = smov [#allocation7]  }
  0x55   : > { %p633_p9 = scmp.ne.s32.totalorder %s925_s11, %s632_s29  ;;  %s637_s26 = sshll.u32 %s743_s5, 4  ;;  %s638_s26 = int_to_ptr.vmem [resolvable:$false] %s637_s26 }
  0x56   : > { %s639_s6 = scalar_lea.vmem %s638_s26, 2048  ;;  %p640_p0 = scmp.lt.s32.totalorder %s925_s11, %s638_s26 }
  0x57   : > { %p635_p5 = pnand %p633_p9, %p619_p10  ;;  %p641_p13 = scmp.lt.s32.totalorder %s639_s6, %s632_s29 }
  0x59   : > { %p636_p8 = pneg %p635_p5  ;;  %p642_p1 = por %p641_p13, %p640_p0 }
  0x5b   : > { %p643_p7 = pnand %p642_p1, %p636_p8 }
  0x5d   : > { %646 = shalt.err (!%p643_p7)
}
  0x5e   : > { %s1066_s27 = smov 128   ;;  %213 = sbr.rel (%p829_p12) target bundleno = 257 (0x101), region = 32 }
  0x5f   : > { %495 = dma.hbm_to_vmem [thread:$0]  (!%p847_p2), %s921_s10, 1024, %s925_s11, %s930_s19, %s1066_s27, %s1066_s27, %s742_s20  }
  0x60   : > { %p1067_p10 = scmp.eq.s32.totalorder (!%p829_p12), %s799_s18, 0 }
  0x65   : > { %700 = dma.done.wait (%p1067_p10), [#allocation3], 1024   ;;  %p1068_p11 = pmov %p1067_p10 }
  0x66   : > { %p1069_p4 = pmov %p1067_p10 }
  0x67   : > { %702 = vsyncadd (%p1068_p11), [#allocation3], 4294966272 }
  0x68   : > { %704 = dma.done.wait (%p1069_p4), [#allocation6], 1024   ;;  %p1070_p3 = pmov %p1069_p4 }
  0x69   : > { %s223_s28 = sand.u32 1, %s799_s18   ;;  %s225_s19 = sand.u32 1, %s721_s13  }
  0x6a   : > { %706 = vsyncadd (%p1070_p3), [#allocation6], 4294966272  ;;  %s975_s24 = sshll.u32 %s225_s19, 6  ;;  %s224_s20 = scalar_lea.sflag [#allocation3], %s223_s28 }
  0x6b   : > { %s227_s10 = scalar_lea.vmem [#allocation7], %s975_s24  ;;  %p1071_p12 = scmp.ne.s32.totalorder %s1060_s21, 0 }
  0x6d   : > { %708 = dma.done.wait (%p1071_p12), %s224_s20, 1024  }
  0x6e   : > { %710 = vsyncadd (%p1071_p12), %s224_s20, 4294966272  ;;  %v256_v0 = vld [vmem:[%s227_s10 + $0x10] sm:$0xff]  ;;  %v254_v1 = vld [vmem:[%s227_s10] sm:$0xff]  ;;  %s744_s11 = smov 64   ;;  %s983_s18 = scalar_lea.vmem [#allocation8], %s975_s24 }
  0x6f   : > { %266 = vrot.lane.b32.xlu1 %v256_v0, %s744_s11  ;;  %262 = vrot.lane.b32.xlu0 %v254_v1, %s744_s11  ;;  %v257_v2 = vld [vmem:[%s227_s10 + $0x18] sm:$0xff]  ;;  %v255_v3 = vld [vmem:[%s227_s10 + $0x8] sm:$0xff]  ;;  %v280_v8 = vld [vmem:[#allocation2 + $0x10] sm:$0xff]  ;;  %s342_s21 = sshll.u32 %s983_s18, 4  ;;  %s472_s8 = sshll.u32 %s729_s15, 10  ;;  %s991_s21 = int_to_ptr.vmem [resolvable:$true] %s342_s21 }
  0x70   : > { %v259_v4 = vld [vmem:[%s227_s10 + $0x28] sm:$0xff]  ;;  %v258_v5 = vld [vmem:[%s227_s10 + $0x20] sm:$0xff]  ;;  %v261_v6 = vld [vmem:[%s227_s10 + $0x38] sm:$0xff]  ;;  %v288_v12 = vmul.f32 %v280_v8, %v256_v0  ;;  %s998_s30 = scalar_lea.hbm %s1054_s3, %s472_s8  ;;  %s1004_s15 = scalar_lea.sflag [#allocation4], %s225_s19 }
  0x71   : > { %v260_v7 = vld [vmem:[%s227_s10 + $0x30] sm:$0xff]  ;;  %v278_v9 = vld [vmem:[#allocation2] sm:$0xff]  ;;  %v281_v14 = vld [vmem:[#allocation2 + $0x18] sm:$0xff]  ;;  %s647_s29 = scalar_lea.vmem %s991_s21, 1024  ;;  %p1072_p6 = scmp.ne.s32.totalorder %s1061_s22, 0 }
  0x72   : > { %v296_v10 = vld [vmem:[#allocation5 + $0x10] sm:$0xff]  ;;  %v294_v11 = vld [vmem:[#allocation5] sm:$0xff]  ;;  %v286_v13 = vmul.f32 %v278_v9, %v254_v1  ;;  %v279_v15 = vld [vmem:[#allocation2 + $0x8] sm:$0xff]  ;;  %v289_v22 = vmul.f32 %v281_v14, %v257_v2  ;;  %p648_p2 = scmp.ne.s32.totalorder %s991_s21, %s647_s29  ;;  %s745_s5 = smov [#allocation8]  }
  0x73   : > { %268 = vrot.lane.b32.xlu1 %v257_v2, %s744_s11  ;;  %264 = vrot.lane.b32.xlu0 %v255_v3, %s744_s11  ;;  %v297_v20 = vld [vmem:[#allocation5 + $0x18] sm:$0xff]  ;;  %v295_v21 = vld [vmem:[#allocation5 + $0x8] sm:$0xff]  ;;  %v287_v23 = vmul.f32 %v279_v15, %v255_v3  ;;  %v282_v27 = vld [vmem:[#allocation2 + $0x20] sm:$0xff]  ;;  %s651_s26 = sshll.u32 %s745_s5, 4  ;;  %s652_s26 = int_to_ptr.vmem [resolvable:$false] %s651_s26 }
  0x74   : > { %v283_v26 = vld [vmem:[#allocation2 + $0x28] sm:$0xff]  ;;  %v298_v33 = vld [vmem:[#allocation5 + $0x20] sm:$0xff]  ;;  %v290_v35 = vmul.f32 %v282_v27, %v258_v5  ;;  %v285_v38 = vld [vmem:[#allocation2 + $0x38] sm:$0xff]  ;;  %p649_p9 = pnand %p648_p2, %p1072_p6  ;;  %s653_s6 = scalar_lea.vmem %s652_s26, 2048 }
  0x75   : > { %v299_v32 = vld [vmem:[#allocation5 + $0x28] sm:$0xff]  ;;  %v291_v34 = vmul.f32 %v283_v26, %v259_v4  ;;  %v284_v39 = vld [vmem:[#allocation2 + $0x30] sm:$0xff]  ;;  %v301_v44 = vld [vmem:[#allocation5 + $0x38] sm:$0xff]  ;;  %v293_v46 = vmul.f32 %v285_v38, %v261_v6  ;;  %p654_p8 = scmp.lt.s32.totalorder %s991_s21, %s652_s26  ;;  %p655_p0 = scmp.lt.s32.totalorder %s653_s6, %s647_s29 }
  0x76   : > { %v300_v45 = vld [vmem:[#allocation5 + $0x30] sm:$0xff]  ;;  %v292_v47 = vmul.f32 %v284_v39, %v260_v7  ;;  %p650_p5 = pneg %p649_p9 }
  0x77   : > { %272 = vrot.lane.b32.xlu1 %v259_v4, %s744_s11  ;;  %270 = vrot.lane.b32.xlu0 %v258_v5, %s744_s11  ;;  %p656_p13 = por %p655_p0, %p654_p8 }
  0x79   : > { %p657_p1 = pnand %p656_p13, %p650_p5 }
  0x7b   : > { %276 = vrot.lane.b32.xlu1 %v261_v6, %s744_s11  ;;  %274 = vrot.lane.b32.xlu0 %v260_v7, %s744_s11 }
  0xe1   : > { %v267_v16 = vpop.permute.xlu1 %266  ;;  %v263_v17 = vpop.permute.xlu0 %262 }
  0xe2   : > { %v304_v18 = vmul.f32 %v296_v10, %v267_v16  ;;  %v302_v19 = vmul.f32 %v294_v11, %v263_v17 }
  0xe4   : > { %v312_v24 = vadd.f32 %v304_v18, %v288_v12  ;;  %v310_v25 = vadd.f32 %v302_v19, %v286_v13 }
  0xe5   : > { %v269_v28 = vpop.permute.xlu1 %268  ;;  %v265_v29 = vpop.permute.xlu0 %264 }
  0xe6   : > { %320 = vst [vmem:[%s983_s18 + $0x10] sm:$0xff] %v312_v24  ;;  %318 = vst [vmem:[%s983_s18] sm:$0xff] %v310_v25  ;;  %v305_v30 = vmul.f32 %v297_v20, %v269_v28  ;;  %v303_v31 = vmul.f32 %v295_v21, %v265_v29 }
  0xe8   : > { %v313_v36 = vadd.f32 %v305_v30, %v289_v22  ;;  %v311_v37 = vadd.f32 %v303_v31, %v287_v23 }
  0xe9   : > { %v273_v40 = vpop.permute.xlu1 %272  ;;  %v271_v41 = vpop.permute.xlu0 %270 }
  0xea   : > { %321 = vst [vmem:[%s983_s18 + $0x18] sm:$0xff] %v313_v36  ;;  %319 = vst [vmem:[%s983_s18 + $0x8] sm:$0xff] %v311_v37  ;;  %v307_v42 = vmul.f32 %v299_v32, %v273_v40  ;;  %v306_v43 = vmul.f32 %v298_v33, %v271_v41 }
  0xec   : > { %v315_v48 = vadd.f32 %v307_v42, %v291_v34  ;;  %v314_v49 = vadd.f32 %v306_v43, %v290_v35 }
  0xed   : > { %v277_v50 = vpop.permute.xlu1 %276  ;;  %v275_v51 = vpop.permute.xlu0 %274 }
  0xee   : > { %323 = vst [vmem:[%s983_s18 + $0x28] sm:$0xff] %v315_v48  ;;  %322 = vst [vmem:[%s983_s18 + $0x20] sm:$0xff] %v314_v49  ;;  %v309_v52 = vmul.f32 %v301_v44, %v277_v50  ;;  %v308_v53 = vmul.f32 %v300_v45, %v275_v51 }
  0xf0   : > { %v317_v54 = vadd.f32 %v309_v52, %v293_v46  ;;  %v316_v55 = vadd.f32 %v308_v53, %v292_v47 }
  0xf2   : > { %325 = vst [vmem:[%s983_s18 + $0x38] sm:$0xff] %v317_v54  ;;  %324 = vst [vmem:[%s983_s18 + $0x30] sm:$0xff] %v316_v55 }
  0xf3   : > { %660 = shalt.err (!%p657_p1)
}
  0xf4   : > { %s661_s27 = scalar_lea.hbm %s998_s30, 1024  ;;  %s665_s24 = scalar_lea.hbm %s1054_s3, 2048 }
  0xf5   : > { %p662_p7 = scmp.ne.s32.totalorder %s998_s30, %s661_s27  ;;  %p666_p4 = scmp.lt.u32.totalorder %s998_s30, %s1054_s3 }
  0xf6   : > { %p667_p3 = scmp.lt.u32.totalorder %s665_s24, %s661_s27  ;;  %p669_p2 = scmp.lt.u32.totalorder %s661_s27, %s998_s30 }
  0xf7   : > { %p663_p10 = pnand %p662_p7, %p1072_p6 }
  0xf8   : > { %p668_p12 = por %p667_p3, %p666_p4 }
  0xf9   : > { %p664_p11 = pneg %p663_p10 }
  0xfa   : > { %p670_p9 = por %p669_p2, %p668_p12 }
  0xfc   : > { %p671_p5 = pnand %p670_p9, %p664_p11 }
  0xfe   : > { %674 = shalt.err (!%p671_p5)
}
  0xff   : > { %s746_s11 = smov 128   ;;  %s747_s18 = smov 8  }
 0x100   : > { %483 = dma.vmem_to_hbm [thread:$0]  (%p1072_p6), %s991_s21, 1024, %s998_s30, %s1004_s15, %s746_s11, %s746_s11, %s747_s18  }
 0x101 PF: > { %s357_s8 = sand.u32 1, %s717_s12   ;;  %p1073_p8 = scmp.ne.s32.totalorder %s1062_s23, 0 }
 0x102   : > { %p1074_p0 = scmp.ge.s32.totalorder %s737_s17, 2  ;;  %s358_s9 = scalar_lea.sflag [#allocation4], %s357_s8 }
 0x104   : > { %p497_p13 = pnand %p1074_p0, %p1073_p8 }
 0x106   : > { %712 = dma.done.wait (!%p497_p13), %s358_s9, 1024  }
 0x107   : > { %714 = vsyncadd (!%p497_p13), %s358_s9, 4294966272  ;;  %s18_s17 = sadd.s32 1, %s737_s17   ;;  %s1075_s12 = smov %s721_s13 }
 0x108   : > { %p15_p1 = scmp.ge.s32.totalorder %s18_s17, 4   ;;  %s1076_s13 = smov %s725_s14 }
 0x109   : > { %s1077_s14 = smov %s928_s25  ;;  %s1078_s15 = smov %s733_s16 }
 0x10a   : > { %s1079_s16 = smov %s1081_s4  ;;  %17 = sbr.rel (!%p15_p1) target bundleno = 6 (0x6), region = 86 }
 0x111   :  { %363 = vsyncpa [#allocation3], 1 }
 0x112   :  { %365 = vsyncpa [#allocation3 + $0x1], 1 }
 0x113   :  { %366 = vsyncpa [#allocation6], 1 }
 0x114   :  { %367 = vsyncpa [#allocation4], 1 }
 0x115   :  { %369 = vsyncpa [#allocation4 + $0x1], 1 }

</bundles_post_ra>
